<compile_context>
chip_gen: v5e
topology: v5e:2x2
jax: 0.10.0
libtpu: 0.0.40
codegen_flags: <defaults>
</compile_context>

<pallas_src>
import functools
import math

import numpy as np

import jax
import jax.numpy as jnp
from jax import lax
from jax.experimental import pallas as pl
from jax.experimental.pallas import tpu as pltpu


def _mlp_kernel(x_ref, *refs, num_layers, compute_dtype):
    """Fused MLP in transposed orientation.

    refs = (w0, b0, w1, b1, ..., w_{L-1}, b_{L-1}, out_ref)

    x_ref  : (TM, d_in)          input row tile (d_in is the full feature dim)
    w_i    : (d_out_i, d_in_i)   PyTorch nn.Linear weight layout, resident in VMEM
    b_i    : (d_out_i, 1)        f32 bias
    out_ref: (d_out, TM)         output tile; M sits in the lane dim -> lane-dense stores
    """
    out_ref = refs[-1]
    params = refs[:-1]

    # MXU-native dtype for the matmuls; accumulation stays f32.
    h_in = x_ref[...].astype(compute_dtype)

    # First layer contracts x's feature dim (last) with w's feature dim (last): w @ x^T.
    dn_first = (((1,), (1,)), ((), ()))   # (d_out, d_in) x (TM, d_in)  -> (d_out, TM)
    dn_rest = (((1,), (0,)), ((), ()))    # (d_out, d_in) x (d_in, TM)  -> (d_out, TM)

    h = None
    for i in range(num_layers):
        w = params[2 * i][...]
        b = params[2 * i + 1][...]                      # (d_out_i, 1) f32
        dn = dn_first if i == 0 else dn_rest
        h = lax.dot_general(w, h_in, dn, preferred_element_type=jnp.float32) + b
        if i < num_layers - 1:
            h = jnp.maximum(h, 0.0)                     # ReLU (f32, full lane occupancy)
            h_in = h.astype(compute_dtype)              # back to MXU-native dtype
    out_ref[...] = h.astype(out_ref.dtype)


def mlp_forward(x, weights, biases, *, tile_m=512, compute_dtype=jnp.bfloat16,
                out_dtype=jnp.float32):
    """Fused MLP forward.

    x:       (..., input_dim)
    weights: list of (d_out_i, d_in_i) arrays (PyTorch nn.Linear.weight layout)
    biases:  list of (d_out_i,) arrays
    returns: (..., output_dim) in out_dtype

    Note: matmuls run in `compute_dtype` (default bf16) with f32 accumulation; pass
    compute_dtype=jnp.float32 for strict-f32 semantics.
    """
    num_layers = len(weights)
    lead_shape = x.shape[:-1]
    d_in = int(x.shape[-1])
    d_out = int(weights[-1].shape[0])

    M = 1
    for s in lead_shape:
        M *= int(s)
    x2 = x.reshape(M, d_in)                 # no dtype cast, no pad: both stay in-kernel

    # Row tile: big to amortize per-step overhead; multiple of 128 so the lane-dense
    # output block is aligned.  For small M use one full-array block (no ragged handling
    # needed, block dims == array dims).
    if M <= tile_m:
        TM = M
    else:
        TM = tile_m
    grid = (pl.cdiv(M, TM),)

    params = []
    in_specs = [pl.BlockSpec((TM, d_in), lambda i: (i, 0))]
    for w, b in zip(weights, biases):
        wc = w.astype(compute_dtype)                    # tiny; cast once
        bc = b.reshape(-1, 1).astype(jnp.float32)       # (d_out_i, 1), bias add in f32
        params.append(wc)
        params.append(bc)
        # Full-array blocks with constant index_map -> weights/biases stay resident in VMEM.
        in_specs.append(pl.BlockSpec(wc.shape, lambda i: (0, 0)))
        in_specs.append(pl.BlockSpec(bc.shape, lambda i: (0, 0)))

    kernel = functools.partial(_mlp_kernel, num_layers=num_layers,
                               compute_dtype=compute_dtype)

    # Roofline bookkeeping for the XLA scheduler.
    x_bytes = int(np.dtype(x2.dtype).itemsize)
    cmp_bytes = int(np.dtype(compute_dtype).itemsize)
    out_bytes = int(np.dtype(out_dtype).itemsize)
    param_bytes = sum(int(w.size) * cmp_bytes + int(b.size) * 4
                      for w, b in zip(weights, biases))
    flops = 2 * M * sum(int(w.shape[0]) * int(w.shape[1]) for w in weights)
    bytes_accessed = M * d_in * x_bytes + M * d_out * out_bytes + param_bytes

    # Explicit VMEM budget (valid on v7x's 64 MiB as well): double-buffered x/out blocks,
    # resident params, f32 layer intermediates, with generous margin.
    widths = [d_in] + [int(w.shape[0]) for w in weights]
    vmem_est = (2 * TM * d_in * x_bytes
                + 2 * TM * d_out * out_bytes
                + 2 * param_bytes
                + 2 * TM * max(widths) * 4)
    vmem_limit = int(min(64 * 1024 * 1024, max(4 * 1024 * 1024, 4 * vmem_est)))

    out = pl.pallas_call(
        kernel,
        out_shape=jax.ShapeDtypeStruct((d_out, M), out_dtype),
        grid_spec=pltpu.PrefetchScalarGridSpec(
            num_scalar_prefetch=0,
            grid=grid,
            in_specs=in_specs,
            out_specs=pl.BlockSpec((d_out, TM), lambda i: (0, i)),
        ),
        compiler_params=pltpu.CompilerParams(
            dimension_semantics=("parallel",),
            vmem_limit_bytes=vmem_limit),
        cost_estimate=pl.CostEstimate(flops=flops, transcendentals=0,
                                      bytes_accessed=bytes_accessed),
    )(x2, *params)

    # Output is (d_out, M); transpose back is over the tiny output only.
    return out.T.reshape(*lead_shape, d_out)


def _reference(x, weights, biases, compute_dtype=jnp.bfloat16):
    """Pure-JAX reference mirroring the PyTorch MLP.forward with the kernel's numerics
    (compute_dtype matmul inputs, f32 accumulation, f32 bias/ReLU)."""
    num_layers = len(weights)
    lead_shape = x.shape[:-1]
    h = x.reshape(-1, x.shape[-1]).astype(compute_dtype)
    y = None
    for i, (w, b) in enumerate(zip(weights, biases)):
        y = jnp.dot(h, w.astype(compute_dtype).T,
                    preferred_element_type=jnp.float32) + b.astype(jnp.float32)
        if i < num_layers - 1:
            y = jnp.maximum(y, 0.0)
            h = y.astype(compute_dtype)
    return y.reshape(*lead_shape, weights[-1].shape[0])


if __name__ == "__main__":
    key = jax.random.PRNGKey(0)

    # MLP(input_dim=16, hidden_dim=32, output_dim=4, num_layers=3)
    input_dim, hidden_dim, output_dim, num_layers = 16, 32, 4, 3
    dims = [input_dim] + [hidden_dim] * (num_layers - 1) + [output_dim]

    # Deterministic params in PyTorch nn.Linear layout (out, in) — consumed natively.
    keys = jax.random.split(key, 2 * num_layers + 1)
    weights, biases = [], []
    for i in range(num_layers):
        n_in, n_out = dims[i], dims[i + 1]
        bound = 1.0 / math.sqrt(n_in)
        weights.append(jax.random.uniform(keys[2 * i], (n_out, n_in), jnp.float32,
                                          -bound, bound))
        biases.append(jax.random.uniform(keys[2 * i + 1], (n_out,), jnp.float32,
                                         -bound, bound))

    # Input: (batch=2, seq=8, input_dim=16)
    x = jax.random.normal(keys[-1], (2, 8, input_dim), dtype=jnp.float32)

    out = mlp_forward(x, weights, biases)
    out = jax.block_until_ready(out)

    ref = _reference(x, weights, biases)
    assert out.shape == (2, 8, output_dim), out.shape
    assert jnp.allclose(out, ref, atol=1e-2, rtol=1e-2), "mismatch vs reference"

    print("KERNEL_OK")
</pallas_src>

<mosaic_0001>
module attributes {stable_mosaic.version = 11 : i64} {
  func.func @_mlp_kernel(%arg0: i32, %arg1: memref<16x16xf32, #tpu.memory_space<vmem>>, %arg2: memref<32x16xbf16, #tpu.memory_space<vmem>>, %arg3: memref<32x1xf32, #tpu.memory_space<vmem>>, %arg4: memref<32x32xbf16, #tpu.memory_space<vmem>>, %arg5: memref<32x1xf32, #tpu.memory_space<vmem>>, %arg6: memref<4x32xbf16, #tpu.memory_space<vmem>>, %arg7: memref<4x1xf32, #tpu.memory_space<vmem>>, %arg8: memref<4x16xf32, #tpu.memory_space<vmem>>) attributes {dimension_semantics = [#tpu.dimension_semantics<parallel>], iteration_bounds = array<i64: 1>, scalar_prefetch = 0 : i64, scratch_operands = 0 : i64, tpu.core_type = #tpu.core_type<tc>, window_params = [{transform_indices = @transform_0, window_bounds = array<i64: 16, 16>}, {pipeline_mode = #tpu.pipeline_mode<synchronous>, transform_indices = @transform_1, window_bounds = array<i64: 32, 16>}, {pipeline_mode = #tpu.pipeline_mode<synchronous>, transform_indices = @transform_2, window_bounds = array<i64: 32, 1>}, {pipeline_mode = #tpu.pipeline_mode<synchronous>, transform_indices = @transform_3, window_bounds = array<i64: 32, 32>}, {pipeline_mode = #tpu.pipeline_mode<synchronous>, transform_indices = @transform_4, window_bounds = array<i64: 32, 1>}, {pipeline_mode = #tpu.pipeline_mode<synchronous>, transform_indices = @transform_5, window_bounds = array<i64: 4, 32>}, {pipeline_mode = #tpu.pipeline_mode<synchronous>, transform_indices = @transform_6, window_bounds = array<i64: 4, 1>}, {transform_indices = @transform_7, window_bounds = array<i64: 4, 16>}]} {
    %c0 = arith.constant 0 : index
    %c0_0 = arith.constant 0 : index
    %0 = vector.load %arg1[%c0, %c0_0] : memref<16x16xf32, #tpu.memory_space<vmem>>, vector<16x16xf32>
    %1 = arith.truncf %0 : vector<16x16xf32> to vector<16x16xbf16>
    %c0_1 = arith.constant 0 : index
    %c0_2 = arith.constant 0 : index
    %2 = vector.load %arg2[%c0_1, %c0_2] : memref<32x16xbf16, #tpu.memory_space<vmem>>, vector<32x16xbf16>
    %c0_3 = arith.constant 0 : index
    %c0_4 = arith.constant 0 : index
    %3 = vector.load %arg3[%c0_3, %c0_4] : memref<32x1xf32, #tpu.memory_space<vmem>>, vector<32x1xf32>
    %cst = arith.constant dense<0.000000e+00> : vector<32x16xf32>
    %4 = tpu.matmul %2, %1, %cst {dimension_numbers = #tpu.dot_dimension_numbers<[1], [1], [0], [0], [0, 0, 1, 0], [], []>} : vector<32x16xbf16>, vector<16x16xbf16>, vector<32x16xf32> -> vector<32x16xf32>
    %5 = vector.broadcast %3 : vector<32x1xf32> to vector<32x16xf32>
    %6 = arith.addf %4, %5 : vector<32x16xf32>
    %cst_5 = arith.constant 0.000000e+00 : f32
    %7 = vector.broadcast %cst_5 : f32 to vector<32x16xf32>
    %8 = arith.maximumf %6, %7 : vector<32x16xf32>
    %9 = arith.truncf %8 : vector<32x16xf32> to vector<32x16xbf16>
    %c0_6 = arith.constant 0 : index
    %c0_7 = arith.constant 0 : index
    %10 = vector.load %arg4[%c0_6, %c0_7] : memref<32x32xbf16, #tpu.memory_space<vmem>>, vector<32x32xbf16>
    %c0_8 = arith.constant 0 : index
    %c0_9 = arith.constant 0 : index
    %11 = vector.load %arg5[%c0_8, %c0_9] : memref<32x1xf32, #tpu.memory_space<vmem>>, vector<32x1xf32>
    %cst_10 = arith.constant dense<0.000000e+00> : vector<32x16xf32>
    %12 = tpu.matmul %10, %9, %cst_10 {dimension_numbers = #tpu.dot_dimension_numbers<[1], [0], [0], [1], [0, 0, 1, 1], [], []>} : vector<32x32xbf16>, vector<32x16xbf16>, vector<32x16xf32> -> vector<32x16xf32>
    %13 = vector.broadcast %11 : vector<32x1xf32> to vector<32x16xf32>
    %14 = arith.addf %12, %13 : vector<32x16xf32>
    %cst_11 = arith.constant 0.000000e+00 : f32
    %15 = vector.broadcast %cst_11 : f32 to vector<32x16xf32>
    %16 = arith.maximumf %14, %15 : vector<32x16xf32>
    %17 = arith.truncf %16 : vector<32x16xf32> to vector<32x16xbf16>
    %c0_12 = arith.constant 0 : index
    %c0_13 = arith.constant 0 : index
    %18 = vector.load %arg6[%c0_12, %c0_13] : memref<4x32xbf16, #tpu.memory_space<vmem>>, vector<4x32xbf16>
    %c0_14 = arith.constant 0 : index
    %c0_15 = arith.constant 0 : index
    %19 = vector.load %arg7[%c0_14, %c0_15] : memref<4x1xf32, #tpu.memory_space<vmem>>, vector<4x1xf32>
    %cst_16 = arith.constant dense<0.000000e+00> : vector<4x16xf32>
    %20 = tpu.matmul %18, %17, %cst_16 {dimension_numbers = #tpu.dot_dimension_numbers<[1], [0], [0], [1], [0, 0, 1, 1], [], []>} : vector<4x32xbf16>, vector<32x16xbf16>, vector<4x16xf32> -> vector<4x16xf32>
    %21 = vector.broadcast %19 : vector<4x1xf32> to vector<4x16xf32>
    %22 = arith.addf %20, %21 : vector<4x16xf32>
    %c0_17 = arith.constant 0 : index
    %c0_18 = arith.constant 0 : index
    %23 = vector.load %arg8[%c0_17, %c0_18] : memref<4x16xf32, #tpu.memory_space<vmem>>, vector<4x16xf32>
    tpu.vector_store %arg8[%c0_17, %c0_18], %22 {strides = array<i32>} : memref<4x16xf32, #tpu.memory_space<vmem>>, vector<4x16xf32>,
    return
  }
  func.func @transform_0(%arg0: i32) -> (i32, i32) {
    %c0_i32 = arith.constant 0 : i32
    %c0_i32_0 = arith.constant 0 : i32
    return %arg0, %c0_i32 : i32, i32
  }
  func.func @transform_1(%arg0: i32) -> (i32, i32) {
    %c0_i32 = arith.constant 0 : i32
    %c0_i32_0 = arith.constant 0 : i32
    %c0_i32_1 = arith.constant 0 : i32
    return %c0_i32, %c0_i32_0 : i32, i32
  }
  func.func @transform_2(%arg0: i32) -> (i32, i32) {
    %c0_i32 = arith.constant 0 : i32
    %c0_i32_0 = arith.constant 0 : i32
    %c0_i32_1 = arith.constant 0 : i32
    return %c0_i32, %c0_i32_0 : i32, i32
  }
  func.func @transform_3(%arg0: i32) -> (i32, i32) {
    %c0_i32 = arith.constant 0 : i32
    %c0_i32_0 = arith.constant 0 : i32
    %c0_i32_1 = arith.constant 0 : i32
    return %c0_i32, %c0_i32_0 : i32, i32
  }
  func.func @transform_4(%arg0: i32) -> (i32, i32) {
    %c0_i32 = arith.constant 0 : i32
    %c0_i32_0 = arith.constant 0 : i32
    %c0_i32_1 = arith.constant 0 : i32
    return %c0_i32, %c0_i32_0 : i32, i32
  }
  func.func @transform_5(%arg0: i32) -> (i32, i32) {
    %c0_i32 = arith.constant 0 : i32
    %c0_i32_0 = arith.constant 0 : i32
    %c0_i32_1 = arith.constant 0 : i32
    return %c0_i32, %c0_i32_0 : i32, i32
  }
  func.func @transform_6(%arg0: i32) -> (i32, i32) {
    %c0_i32 = arith.constant 0 : i32
    %c0_i32_0 = arith.constant 0 : i32
    %c0_i32_1 = arith.constant 0 : i32
    return %c0_i32, %c0_i32_0 : i32, i32
  }
  func.func @transform_7(%arg0: i32) -> (i32, i32) {
    %c0_i32 = arith.constant 0 : i32
    %c0_i32_0 = arith.constant 0 : i32
    return %c0_i32, %arg0 : i32, i32
  }
}

</mosaic_0001>

<bundles_post_ra>
// kernel: tpu_custom_call.1
= control target key start
LH: loop header
LB: loop body
LE: loop exit
PB: predicated region body
PF: predicated region fallthrough
CT: control target
= control target key end

     0   :  { %vm69_vm0 = vcmask 130048   ;;  %v272_v3 = vmov 0   ;;  %s371_s0 = inlined_call_operand.vmem [shape: f32[16,16], index: 0, kind: input, shape index: {}]   ;;  %s372_s1 = inlined_call_operand.vmem [shape: bf16[32,16], index: 1, kind: input, shape index: {}]   ;;  %s373_s2 = inlined_call_operand.vmem [shape: f32[32,1], index: 2, kind: input, shape index: {}]   ;;  %s374_s3 = inlined_call_operand.vmem [shape: bf16[32,32], index: 3, kind: input, shape index: {}]   ;;  %s375_s4 = inlined_call_operand.vmem [shape: f32[32,1], index: 4, kind: input, shape index: {}]   ;;  %s376_s5 = inlined_call_operand.vmem [shape: bf16[4,32], index: 5, kind: input, shape index: {}]   ;;  %s377_s6 = inlined_call_operand.vmem [shape: f32[4,1], index: 6, kind: input, shape index: {}]   ;;  %s378_s7 = inlined_call_operand.hbm [shape: f32[4,16], index: 7, kind: output, shape index: {}]  }
   0x1   :  { %v28_v0 = vld [vmem:[%s371_s0] sm:$0xff]  ;;  %v29_v1 = vld [vmem:[%s371_s0 + $0x8] sm:$0xff]  ;;  %243 = vset.pattern.permute.xlu0 %v272_v3  ;;  %v37_v4 = vld [vmem:[%s373_s2 + $0x10] sm:$0xff]  ;;  %244 = vset.pattern.permute.xlu1 %v272_v3 }
   0x2   :  { %v30_v2 = vpack.c.bf16 %v29_v1, %v28_v0  ;;  %v35_v5 = vld [vmem:[%s373_s2] sm:$0xff]  ;;  %51 = vperm.xlu0 %243, %v37_v4   ;;  %245 = vset.pattern.permute.xlu2 %v272_v3 }
   0x3   :  { %41 = vperm.xlu1 %244, %v35_v5  }
   0x4   :  { %v77_v6 = vsel %vm69_vm0, %v30_v2, 0 }
   0x5   :  { %12 = vsyncpa [#allocation3], 0  ;;  %240 = vmatpush.bf16.xpose.msra.mxu3 %v77_v6  ;;  %86 = vmatpush.bf16.xpose.msra.mxu0 %v77_v6  ;;  %v237_v7 = vld [vmem:[%s372_s1 + $0x8] sm:$0xff]  ;;  %v236_v8 = vld [vmem:[%s372_s1] sm:$0xff]  ;;  %vm142_vm1 = vcmask 261120   ;;  %s273_s27 = smov [#allocation2]  }
   0x6   :  { %v38_v9 = vld [vmem:[%s373_s2 + $0x18] sm:$0xff]  ;;  %v36_v10 = vld [vmem:[%s373_s2 + $0x8] sm:$0xff]  ;;  %v108_v11 = vld [vmem:[%s375_s4] sm:$0xff]  ;;  %s204_s28 = sshll.u32 %s273_s27, 4  ;;  %s206_s8 = sshll.u32 %s378_s7, 4  ;;  %vm197_vm2 = vcmask 125952   ;;  %s205_s28 = int_to_ptr.vmem [resolvable:$true] %s204_s28  ;;  %s207_s8 = int_to_ptr.hbm [resolvable:$true] %s206_s8 }
   0x7   :  { %v109_v12 = vld [vmem:[%s375_s4 + $0x8] sm:$0xff]  ;;  %v110_v18 = vld [vmem:[%s375_s4 + $0x10] sm:$0xff]  ;;  %v111_v28 = vld [vmem:[%s375_s4 + $0x18] sm:$0xff] }
   0x8   :  { %124 = vperm.xlu2 %245, %v110_v18   ;;  %v238_v33 = vld [vmem:[%s374_s3] sm:$0xff]  ;;  %v239_v35 = vld [vmem:[%s374_s3 + $0x8] sm:$0xff] }
   0x9   :  { %v175_v34 = vld [vmem:[%s377_s6] sm:$0xf] }
   0xa   :  { %56 = vperm.xlu0 %243, %v38_v9   ;;  %v174_v54 = vld [vmem:[%s376_s5] sm:$0x3] }
   0xb   :  { %46 = vperm.xlu1 %244, %v36_v10  }
   0xc   :  { %224 = vmatmul.msk.bf16.vlgmr.msra.gmra.mxu3 %vm69_vm0, %v237_v7  ;;  %223 = vmatmul.msk.bf16.vlgmr.msra.gmra.mxu0 %vm69_vm0, %v236_v8 }
  0x10   :  { %129 = vperm.xlu2 %245, %v111_v28  }
  0x12   :  { %114 = vperm.xlu0 %243, %v108_v11  }
  0x13   :  { %119 = vperm.xlu1 %244, %v109_v12  }
  0x18   :  { %178 = vperm.xlu2 %245, %v175_v34  }
  0x62   :  { %v125_v38 = vpop.permute.xlu2 %124 }
  0x6a   :  { %v130_v42 = vpop.permute.xlu2 %129 }
  0x72   :  { %v179_v55 = vpop.permute.xlu2 %178 }
  0x74   :  { %v52_v14 = vpop.permute.xlu0 %51 }
  0x75   :  { %v42_v15 = vpop.permute.xlu1 %41 }
  0x7c   :  { %v57_v19 = vpop.permute.xlu0 %56 }
  0x7d   :  { %v47_v21 = vpop.permute.xlu1 %46 }
  0x84   :  { %v115_v46 = vpop.permute.xlu0 %114 }
  0x85   :  { %v120_v40 = vpop.permute.xlu1 %119 }
  0x89   :  { %v88_v13 = vpop.f32.mrf.mxu0 }
  0x8a   :  { %v89_v23 = vadd.f32 %v88_v13, %v42_v15 }
  0x8c   :  { %v98_v29 = vmax.f32 %v89_v23, 0.0 }
  0x8f   :  { %v93_v16 = vpop.f32.mrf.mxu3 }
  0x90   :  { %v94_v20 = vadd.f32 %v93_v16, %v52_v14 }
  0x91   :  { %v90_v17 = vpop.f32.mrf.mxu0 }
  0x92   :  { %v91_v24 = vadd.f32 %v90_v17, %v47_v21  ;;  %v100_v26 = vmax.f32 %v94_v20, 0.0 }
  0x94   :  { %v99_v30 = vmax.f32 %v91_v24, 0.0 }
  0x96   :  { %v102_v32 = vpack.c.bf16 %v99_v30, %v98_v29 }
  0x97   :  { %v95_v22 = vpop.f32.mrf.mxu3 }
  0x98   :  { %v96_v25 = vadd.f32 %v95_v22, %v57_v19 }
  0x9a   :  { %v101_v27 = vmax.f32 %v96_v25, 0.0 }
  0x9c   :  { %v103_v31 = vpack.c.bf16 %v101_v27, %v100_v26 }
  0x9e   :  { %155 = vmatpush.bf16.msra.mxu1 %v103_v31 }
  0xa2   :  { %156 = vmatpush.bf16.msra.mxu1 %v102_v32 }
  0xa5   :  { %233 = vmatmul.msk.bf16.vlgmr.msra.gmra.mxu1 %vm142_vm1, %v238_v33 }
  0xb5   :  { %234 = vmatmul.msk.bf16.gmra.mxu1 %vm142_vm1, %v239_v35 }
 0x122   :  { %v158_v36 = vpop.f32.mrf.mxu1 }
 0x123   :  { %v159_v47 = vadd.f32 %v158_v36, %v115_v46 }
 0x125   :  { %v168_v52 = vmax.f32 %v159_v47, 0.0 }
 0x12a   :  { %v160_v37 = vpop.f32.mrf.mxu1 }
 0x12b   :  { %v161_v44 = vadd.f32 %v160_v37, %v120_v40 }
 0x12d   :  { %v169_v50 = vmax.f32 %v161_v44, 0.0 }
 0x12f   :  { %v172_v53 = vpack.c.bf16 %v169_v50, %v168_v52 }
 0x132   :  { %v163_v39 = vpop.f32.mrf.mxu1 }
 0x133   :  { %v164_v41 = vadd.f32 %v163_v39, %v125_v38 }
 0x135   :  { %v170_v48 = vmax.f32 %v164_v41, 0.0 }
 0x13a   :  { %v165_v43 = vpop.f32.mrf.mxu1 }
 0x13b   :  { %v166_v45 = vadd.f32 %v165_v43, %v130_v42 }
 0x13d   :  { %v171_v49 = vmax.f32 %v166_v45, 0.0 }
 0x13f   :  { %v173_v51 = vpack.c.bf16 %v171_v49, %v170_v48 }
 0x141   :  { %190 = vmatpush.bf16.msra.mxu2 %v173_v51 }
 0x145   :  { %191 = vmatpush.bf16.msra.mxu2 %v172_v53 }
 0x148   :  { %235 = vmatmul.msk.bf16.vlgmr.msra.gmra.mxu2 %vm142_vm1, %v174_v54 }
 0x1cb   :  { %v193_v56 = vpop.f32.mrf.mxu2 }
 0x1cc   :  { %v194_v57 = vadd.f32 %v193_v56, %v179_v55 }
 0x1ce   :  { %198 = vst.msk [vmem:[#allocation2] sm:$0xf] %vm197_vm2, %v194_v57 }
 0x1cf   :  { %209 = dma.vmem_to_hbm [thread:$0]  %s205_s28, 64, %s207_s8, [#allocation3]  }
 0x1d3   :  { %v195_v58 = vpop.f32.mrf.mxu2 }
 0x1d4   :  { %270 = dma.done.wait [#allocation3], 64  }
 0x1d5   :  { %271 = vsyncadd [#allocation3], 4294967232 }
 0x1d6   :  { %214 = vsyncpa [#allocation3], 1 }

</bundles_post_ra>
